<compile_context>
chip_gen: v5e
topology: v5e:2x2
jax: 0.10.0
libtpu: 0.0.40
codegen_flags: <defaults>
</compile_context>

<pallas_src>
import math

import jax
import jax.numpy as jnp
from jax.experimental import pallas as pl
from jax.experimental.pallas import tpu as pltpu

N_HIDDEN = 64
N_OUT_PAD = 128  # lane-dense padded head output width (policy_dim + 1 <= 128)


def _round_up(x, m):
    return (x + m - 1) // m * m


def mlp_kernel(x_ref, w1_ref, b1_ref, w2_ref, b2_ref, wh_ref, bh_ref, out_ref):
    """Fused 3-matmul MLP forward for one batch tile (weights VMEM-resident)."""
    x = x_ref[...]
    # feature layer 1 + tanh
    h1 = jnp.tanh(
        jnp.dot(x, w1_ref[...], preferred_element_type=jnp.float32) + b1_ref[...]
    )
    # feature layer 2 + tanh
    h2 = jnp.tanh(
        jnp.dot(h1, w2_ref[...], preferred_element_type=jnp.float32) + b2_ref[...]
    )
    # fused policy+value heads -> single lane-dense (TB, 128) store
    out_ref[...] = (
        jnp.dot(h2, wh_ref[...], preferred_element_type=jnp.float32) + bh_ref[...]
    )


def mlp_forward(x, params, policy_dim, tb=512):
    """Runs the batch-tiled fused Pallas kernel.

    x: (B, in_dim) f32.  Returns (policy (B, policy_dim), value (B, 1))."""
    B, in_dim = x.shape

    # Tile size: multiple of 8 sublanes, capped at 512 rows; pad B to a multiple.
    TB = min(tb, _round_up(max(B, 1), 8))
    Bp = _round_up(B, TB)
    if Bp != B:
        x = jnp.pad(x, ((0, Bp - B), (0, 0)))
    grid = (Bp // TB,)

    in_specs = [
        pl.BlockSpec((TB, in_dim), lambda i: (i, 0)),            # x tile (streams)
        pl.BlockSpec((in_dim, N_HIDDEN), lambda i: (0, 0)),      # w1 (resident)
        pl.BlockSpec((1, N_HIDDEN), lambda i: (0, 0)),           # b1
        pl.BlockSpec((N_HIDDEN, N_HIDDEN), lambda i: (0, 0)),    # w2
        pl.BlockSpec((1, N_HIDDEN), lambda i: (0, 0)),           # b2
        pl.BlockSpec((N_HIDDEN, N_OUT_PAD), lambda i: (0, 0)),   # fused heads W
        pl.BlockSpec((1, N_OUT_PAD), lambda i: (0, 0)),          # fused heads b
    ]
    out_specs = pl.BlockSpec((TB, N_OUT_PAD), lambda i: (i, 0))

    flops = 2 * Bp * (in_dim * N_HIDDEN + N_HIDDEN * N_HIDDEN + N_HIDDEN * N_OUT_PAD)
    transcendentals = 2 * Bp * N_HIDDEN
    bytes_accessed = 4 * (
        Bp * in_dim                                   # x in
        + in_dim * N_HIDDEN + N_HIDDEN                # w1, b1
        + N_HIDDEN * N_HIDDEN + N_HIDDEN              # w2, b2
        + N_HIDDEN * N_OUT_PAD + N_OUT_PAD            # wh, bh
        + Bp * N_OUT_PAD                              # out
    )

    out = pl.pallas_call(
        mlp_kernel,
        out_shape=jax.ShapeDtypeStruct((Bp, N_OUT_PAD), jnp.float32),
        grid_spec=pltpu.PrefetchScalarGridSpec(
            num_scalar_prefetch=0,
            grid=grid,
            in_specs=in_specs,
            out_specs=out_specs,
        ),
        compiler_params=pltpu.CompilerParams(
            dimension_semantics=("parallel",),
            vmem_limit_bytes=32 * 1024 * 1024,
        ),
        cost_estimate=pl.CostEstimate(
            flops=flops,
            transcendentals=transcendentals,
            bytes_accessed=bytes_accessed,
        ),
    )(
        x,
        params["w1"], params["b1"],
        params["w2"], params["b2"],
        params["wh"], params["bh"],
    )

    policy = out[:B, :policy_dim]
    value = out[:B, policy_dim:policy_dim + 1]
    return policy, value


def orthogonal_init(key, out_dim, in_dim, gain):
    """Deterministic orthogonal init matching torch.nn.init.orthogonal_ semantics.

    Returns a (out_dim, in_dim) matrix (PyTorch weight layout)."""
    rows, cols = out_dim, in_dim
    a = jax.random.normal(key, (rows, cols), dtype=jnp.float32)
    if rows < cols:
        a = a.T
    q, r = jnp.linalg.qr(a)
    d = jnp.sign(jnp.diag(r))
    q = q * d[None, :]
    if rows < cols:
        q = q.T
    return (gain * q).astype(jnp.float32)


def make_params(key, in_dim, policy_dim):
    assert policy_dim + 1 <= N_OUT_PAD, "fused head assumes policy_dim + 1 <= 128"
    k1, k2, k3, k4 = jax.random.split(key, 4)
    # PyTorch layout is (out, in); transpose to (in, out) so y = x @ W + b.
    w1 = orthogonal_init(k1, N_HIDDEN, in_dim, math.sqrt(2)).T       # (in_dim, 64)
    w2 = orthogonal_init(k2, N_HIDDEN, N_HIDDEN, math.sqrt(2)).T     # (64, 64)
    wp = orthogonal_init(k3, policy_dim, N_HIDDEN, 0.01).T           # (64, policy_dim)
    wv = orthogonal_init(k4, 1, N_HIDDEN, 1.0).T                     # (64, 1)
    # Fused, lane-dense head weight: [policy | value | zero-pad] -> (64, 128).
    wh = jnp.zeros((N_HIDDEN, N_OUT_PAD), jnp.float32)
    wh = wh.at[:, :policy_dim].set(wp)
    wh = wh.at[:, policy_dim:policy_dim + 1].set(wv)
    return {
        "w1": w1, "b1": jnp.zeros((1, N_HIDDEN), jnp.float32),
        "w2": w2, "b2": jnp.zeros((1, N_HIDDEN), jnp.float32),
        "wh": wh, "bh": jnp.zeros((1, N_OUT_PAD), jnp.float32),
    }


def mlp_reference(x, params, policy_dim):
    h1 = jnp.tanh(x @ params["w1"] + params["b1"])
    h2 = jnp.tanh(h1 @ params["w2"] + params["b2"])
    heads = h2 @ params["wh"] + params["bh"]
    return heads[:, :policy_dim], heads[:, policy_dim:policy_dim + 1]


if __name__ == "__main__":
    B, in_dim, policy_dim = 4, 32, 8

    key = jax.random.PRNGKey(0)
    kx, kp = jax.random.split(key)
    x = jax.random.normal(kx, (B, in_dim), dtype=jnp.float32)
    params = make_params(kp, in_dim, policy_dim)

    pol, val = mlp_forward(x, params, policy_dim)
    jax.block_until_ready((pol, val))

    # sanity check against pure-JAX reference
    pol_ref, val_ref = mlp_reference(x, params, policy_dim)
    assert pol.shape == (B, policy_dim) and val.shape == (B, 1)
    assert jnp.allclose(pol, pol_ref, atol=1e-5, rtol=1e-5)
    assert jnp.allclose(val, val_ref, atol=1e-5, rtol=1e-5)

    # also exercise a batch that is not a multiple of the tile (padding path)
    B2 = 37
    x2 = jax.random.normal(jax.random.PRNGKey(1), (B2, in_dim), dtype=jnp.float32)
    pol2, val2 = mlp_forward(x2, params, policy_dim)
    jax.block_until_ready((pol2, val2))
    pol2_ref, val2_ref = mlp_reference(x2, params, policy_dim)
    assert pol2.shape == (B2, policy_dim) and val2.shape == (B2, 1)
    assert jnp.allclose(pol2, pol2_ref, atol=1e-5, rtol=1e-5)
    assert jnp.allclose(val2, val2_ref, atol=1e-5, rtol=1e-5)

    print("KERNEL_OK")
</pallas_src>

<mosaic_0001>
module attributes {stable_mosaic.version = 11 : i64} {
  func.func @mlp_kernel(%arg0: i32, %arg1: memref<8x32xf32, #tpu.memory_space<vmem>>, %arg2: memref<32x64xf32, #tpu.memory_space<vmem>>, %arg3: memref<1x64xf32, #tpu.memory_space<vmem>>, %arg4: memref<64x64xf32, #tpu.memory_space<vmem>>, %arg5: memref<1x64xf32, #tpu.memory_space<vmem>>, %arg6: memref<64x128xf32, #tpu.memory_space<vmem>>, %arg7: memref<1x128xf32, #tpu.memory_space<vmem>>, %arg8: memref<8x128xf32, #tpu.memory_space<vmem>>) attributes {dimension_semantics = [#tpu.dimension_semantics<parallel>], iteration_bounds = array<i64: 1>, scalar_prefetch = 0 : i64, scratch_operands = 0 : i64, tpu.core_type = #tpu.core_type<tc>, window_params = [{transform_indices = @transform_0, window_bounds = array<i64: 8, 32>}, {pipeline_mode = #tpu.pipeline_mode<synchronous>, transform_indices = @transform_1, window_bounds = array<i64: 32, 64>}, {pipeline_mode = #tpu.pipeline_mode<synchronous>, transform_indices = @transform_2, window_bounds = array<i64: 1, 64>}, {pipeline_mode = #tpu.pipeline_mode<synchronous>, transform_indices = @transform_3, window_bounds = array<i64: 64, 64>}, {pipeline_mode = #tpu.pipeline_mode<synchronous>, transform_indices = @transform_4, window_bounds = array<i64: 1, 64>}, {pipeline_mode = #tpu.pipeline_mode<synchronous>, transform_indices = @transform_5, window_bounds = array<i64: 64, 128>}, {pipeline_mode = #tpu.pipeline_mode<synchronous>, transform_indices = @transform_6, window_bounds = array<i64: 1, 128>}, {transform_indices = @transform_7, window_bounds = array<i64: 8, 128>}]} {
    %c0 = arith.constant 0 : index
    %c0_0 = arith.constant 0 : index
    %0 = vector.load %arg1[%c0, %c0_0] : memref<8x32xf32, #tpu.memory_space<vmem>>, vector<8x32xf32>
    %c0_1 = arith.constant 0 : index
    %c0_2 = arith.constant 0 : index
    %1 = vector.load %arg2[%c0_1, %c0_2] : memref<32x64xf32, #tpu.memory_space<vmem>>, vector<32x64xf32>
    %cst = arith.constant dense<0.000000e+00> : vector<8x64xf32>
    %2 = tpu.matmul %0, %1, %cst {dimension_numbers = #tpu.dot_dimension_numbers<[1], [0], [0], [1], [0, 0, 1, 1], [], []>} : vector<8x32xf32>, vector<32x64xf32>, vector<8x64xf32> -> vector<8x64xf32>
    %c0_3 = arith.constant 0 : index
    %c0_4 = arith.constant 0 : index
    %3 = vector.load %arg3[%c0_3, %c0_4] : memref<1x64xf32, #tpu.memory_space<vmem>>, vector<1x64xf32>
    %4 = vector.broadcast %3 : vector<1x64xf32> to vector<8x64xf32>
    %5 = arith.addf %2, %4 : vector<8x64xf32>
    %6 = math.tanh %5 : vector<8x64xf32>
    %c0_5 = arith.constant 0 : index
    %c0_6 = arith.constant 0 : index
    %7 = vector.load %arg4[%c0_5, %c0_6] : memref<64x64xf32, #tpu.memory_space<vmem>>, vector<64x64xf32>
    %cst_7 = arith.constant dense<0.000000e+00> : vector<8x64xf32>
    %8 = tpu.matmul %6, %7, %cst_7 {dimension_numbers = #tpu.dot_dimension_numbers<[1], [0], [0], [1], [0, 0, 1, 1], [], []>} : vector<8x64xf32>, vector<64x64xf32>, vector<8x64xf32> -> vector<8x64xf32>
    %c0_8 = arith.constant 0 : index
    %c0_9 = arith.constant 0 : index
    %9 = vector.load %arg5[%c0_8, %c0_9] : memref<1x64xf32, #tpu.memory_space<vmem>>, vector<1x64xf32>
    %10 = vector.broadcast %9 : vector<1x64xf32> to vector<8x64xf32>
    %11 = arith.addf %8, %10 : vector<8x64xf32>
    %12 = math.tanh %11 : vector<8x64xf32>
    %c0_10 = arith.constant 0 : index
    %c0_11 = arith.constant 0 : index
    %13 = vector.load %arg6[%c0_10, %c0_11] : memref<64x128xf32, #tpu.memory_space<vmem>>, vector<64x128xf32>
    %cst_12 = arith.constant dense<0.000000e+00> : vector<8x128xf32>
    %14 = tpu.matmul %12, %13, %cst_12 {dimension_numbers = #tpu.dot_dimension_numbers<[1], [0], [0], [1], [0, 0, 1, 1], [], []>} : vector<8x64xf32>, vector<64x128xf32>, vector<8x128xf32> -> vector<8x128xf32>
    %c0_13 = arith.constant 0 : index
    %c0_14 = arith.constant 0 : index
    %15 = vector.load %arg7[%c0_13, %c0_14] : memref<1x128xf32, #tpu.memory_space<vmem>>, vector<1x128xf32>
    %16 = vector.broadcast %15 : vector<1x128xf32> to vector<8x128xf32>
    %17 = arith.addf %14, %16 : vector<8x128xf32>
    %c0_15 = arith.constant 0 : index
    %c0_16 = arith.constant 0 : index
    %18 = vector.load %arg8[%c0_15, %c0_16] : memref<8x128xf32, #tpu.memory_space<vmem>>, vector<8x128xf32>
    tpu.vector_store %arg8[%c0_15, %c0_16], %17 {strides = array<i32>} : memref<8x128xf32, #tpu.memory_space<vmem>>, vector<8x128xf32>,
    return
  }
  func.func @transform_0(%arg0: i32) -> (i32, i32) {
    %c0_i32 = arith.constant 0 : i32
    %c0_i32_0 = arith.constant 0 : i32
    return %arg0, %c0_i32 : i32, i32
  }
  func.func @transform_1(%arg0: i32) -> (i32, i32) {
    %c0_i32 = arith.constant 0 : i32
    %c0_i32_0 = arith.constant 0 : i32
    %c0_i32_1 = arith.constant 0 : i32
    return %c0_i32, %c0_i32_0 : i32, i32
  }
  func.func @transform_2(%arg0: i32) -> (i32, i32) {
    %c0_i32 = arith.constant 0 : i32
    %c0_i32_0 = arith.constant 0 : i32
    %c0_i32_1 = arith.constant 0 : i32
    return %c0_i32, %c0_i32_0 : i32, i32
  }
  func.func @transform_3(%arg0: i32) -> (i32, i32) {
    %c0_i32 = arith.constant 0 : i32
    %c0_i32_0 = arith.constant 0 : i32
    %c0_i32_1 = arith.constant 0 : i32
    return %c0_i32, %c0_i32_0 : i32, i32
  }
  func.func @transform_4(%arg0: i32) -> (i32, i32) {
    %c0_i32 = arith.constant 0 : i32
    %c0_i32_0 = arith.constant 0 : i32
    %c0_i32_1 = arith.constant 0 : i32
    return %c0_i32, %c0_i32_0 : i32, i32
  }
  func.func @transform_5(%arg0: i32) -> (i32, i32) {
    %c0_i32 = arith.constant 0 : i32
    %c0_i32_0 = arith.constant 0 : i32
    %c0_i32_1 = arith.constant 0 : i32
    return %c0_i32, %c0_i32_0 : i32, i32
  }
  func.func @transform_6(%arg0: i32) -> (i32, i32) {
    %c0_i32 = arith.constant 0 : i32
    %c0_i32_0 = arith.constant 0 : i32
    %c0_i32_1 = arith.constant 0 : i32
    return %c0_i32, %c0_i32_0 : i32, i32
  }
  func.func @transform_7(%arg0: i32) -> (i32, i32) {
    %c0_i32 = arith.constant 0 : i32
    %c0_i32_0 = arith.constant 0 : i32
    return %arg0, %c0_i32 : i32, i32
  }
}

</mosaic_0001>

<bundles_post_ra>
// kernel: tpu_custom_call.1
= control target key start
LH: loop header
LB: loop body
LE: loop exit
PB: predicated region body
PF: predicated region fallthrough
CT: control target
= control target key end

     0   :  { %12 = vsyncpa [#allocation3], 0  ;;  %s432_s0 = inlined_call_operand.hbm [shape: f32[8,32], index: 0, kind: input, shape index: {}]   ;;  %s433_s1 = inlined_call_operand.hbm [shape: f32[32,64], index: 1, kind: input, shape index: {}]   ;;  %s434_s2 = inlined_call_operand.vmem [shape: f32[1,64], index: 2, kind: input, shape index: {}]   ;;  %s435_s3 = inlined_call_operand.hbm [shape: f32[64,64], index: 3, kind: input, shape index: {}]   ;;  %s436_s4 = inlined_call_operand.vmem [shape: f32[1,64], index: 4, kind: input, shape index: {}]   ;;  %s437_s5 = inlined_call_operand.hbm [shape: f32[64,128], index: 5, kind: input, shape index: {}]   ;;  %s438_s6 = inlined_call_operand.vmem [shape: f32[1,128], index: 6, kind: input, shape index: {}]   ;;  %s439_s7 = inlined_call_operand.hbm [shape: f32[8,128], index: 7, kind: output, shape index: {}]  }
   0x1   :  { %13 = vsyncpa [#allocation6], 0 }
   0x2   :  { %14 = vsyncpa [#allocation9], 0  ;;  %s31_s26 = sshll.u32 %s433_s1, 4  ;;  %s32_s26 = int_to_ptr.hbm [resolvable:$true] %s31_s26 }
   0x3   :  { %15 = vsyncpa [#allocation4], 0  ;;  %s359_s27 = smov [#allocation5]   ;;  %s21_s8 = sshll.u32 %s432_s0, 4  ;;  %s22_s8 = int_to_ptr.hbm [resolvable:$true] %s21_s8 }
   0x4   :  { %s33_s28 = sshll.u32 %s359_s27, 4  ;;  %s360_s9 = smov 128   ;;  %s34_s28 = int_to_ptr.vmem [resolvable:$true] %s33_s28 }
   0x5   :  { %s361_s10 = smov 8   ;;  %s362_s11 = smov [#allocation2]  }
   0x6   :  { %39 = dma.hbm_to_vmem [thread:$0]  %s32_s26, 512, %s34_s28, [#allocation6], %s360_s9, %s360_s9, %s361_s10  }
   0x7   :  { %s23_s12 = sshll.u32 %s362_s11, 4  ;;  %s46_s15 = sshll.u32 %s435_s3, 4  ;;  %s24_s12 = int_to_ptr.vmem [resolvable:$true] %s23_s12  ;;  %s47_s15 = int_to_ptr.hbm [resolvable:$true] %s46_s15 }
   0x8   :  { %26 = dma.hbm_to_vmem [thread:$0]  %s22_s8, 128, %s24_s12, [#allocation3]  }
   0x9   :  { %s61_s17 = sshll.u32 %s437_s5, 4  ;;  %s363_s18 = smov [#allocation7]   ;;  %s62_s17 = int_to_ptr.hbm [resolvable:$true] %s61_s17 }
   0xa   :  { %s48_s19 = sshll.u32 %s363_s18, 4  ;;  %s364_s0 = smov [#allocation8]   ;;  %s49_s19 = int_to_ptr.vmem [resolvable:$true] %s48_s19 }
   0xb   :  { %54 = dma.hbm_to_vmem [thread:$0]  %s47_s15, 1024, %s49_s19, [#allocation6], %s360_s9, %s360_s9, %s361_s10  }
   0xc   :  { %s63_s20 = sshll.u32 %s364_s0, 4  ;;  %s64_s20 = int_to_ptr.vmem [resolvable:$true] %s63_s20 }
   0xd   :  { %69 = dma.hbm_to_vmem [thread:$0]  %s62_s17, 1024, %s64_s20, [#allocation9], %s360_s9, %s360_s9, %s361_s10  }
   0xe   :  { %351 = dma.done.wait [#allocation3], 128  }
   0xf   :  { %352 = vsyncadd [#allocation3], 4294967168 }
  0x10   :  { %353 = dma.done.wait [#allocation6], 1536  }
  0x11   :  { %354 = vsyncadd [#allocation6], 4294965760 }
  0x12   :  { %355 = dma.done.wait [#allocation9], 1024  }
  0x13   :  { %356 = vsyncadd [#allocation9], 4294966272  ;;  %v92_v0 = vld [vmem:[#allocation5 + $0x18] sm:$0xff]  ;;  %v91_v1 = vld [vmem:[#allocation5 + $0x10] sm:$0xff]  ;;  %vm97_vm0 = vcmask 261120   ;;  %vm134_vm1 = vcmask 523264  }
  0x14   :  { %113 = vmatpush.msra.mxu0 %v92_v0  ;;  %v129_v2 = vld [vmem:[#allocation7 + $0x38] sm:$0xff]  ;;  %v90_v3 = vld [vmem:[#allocation5 + $0x8] sm:$0xff]  ;;  %v128_v4 = vld [vmem:[#allocation7 + $0x30] sm:$0xff]  ;;  %s365_s24 = smov [#allocation10]   ;;  %s202_s28 = sshll.u32 %s439_s7, 4  ;;  %s203_s28 = int_to_ptr.hbm [resolvable:$true] %s202_s28 }
  0x15   :  { %146 = vmatpush.msra.mxu1 %v129_v2  ;;  %v127_v5 = vld [vmem:[#allocation7 + $0x28] sm:$0xff]  ;;  %v89_v6 = vld [vmem:[#allocation5] sm:$0xff]  ;;  %v88_v7 = vld [vmem:[#allocation2] sm:$0xff]  ;;  %s200_s25 = sshll.u32 %s365_s24, 4  ;;  %s201_s25 = int_to_ptr.vmem [resolvable:$true] %s200_s25 }
  0x16   :  { %114 = vmatpush.msra.mxu0 %v91_v1  ;;  %v126_v8 = vld [vmem:[#allocation7 + $0x20] sm:$0xff]  ;;  %v125_v9 = vld [vmem:[#allocation7 + $0x18] sm:$0xff]  ;;  %v124_v10 = vld [vmem:[#allocation7 + $0x10] sm:$0xff] }
  0x17   :  { %147 = vmatpush.msra.mxu1 %v128_v4  ;;  %v123_v11 = vld [vmem:[#allocation7 + $0x8] sm:$0xff]  ;;  %v122_v12 = vld [vmem:[#allocation7] sm:$0xff]  ;;  %v166_v13 = vld [vmem:[#allocation8 + $0x38] sm:$0xff] }
  0x18   :  { %115 = vmatpush.msra.mxu0 %v90_v3  ;;  %v165_v14 = vld [vmem:[#allocation8 + $0x30] sm:$0xff]  ;;  %182 = vmatpush.msra.mxu2 %v166_v13  ;;  %v164_v15 = vld [vmem:[#allocation8 + $0x28] sm:$0xff]  ;;  %v224_v16 = vld [vmem:[%s434_s2] ss:$0 sm:$0xff] }
  0x19   :  { %148 = vmatpush.msra.mxu1 %v127_v5  ;;  %v163_v20 = vld [vmem:[#allocation8 + $0x20] sm:$0xff]  ;;  %v162_v21 = vld [vmem:[#allocation8 + $0x18] sm:$0xff]  ;;  %v161_v22 = vld [vmem:[#allocation8 + $0x10] sm:$0xff] }
  0x1a   :  { %116 = vmatpush.msra.mxu0 %v89_v6  ;;  %183 = vmatpush.msra.mxu2 %v165_v14  ;;  %v160_v23 = vld [vmem:[#allocation8 + $0x8] sm:$0xff]  ;;  %v159_v24 = vld [vmem:[#allocation8] sm:$0xff]  ;;  %v225_v25 = vld [vmem:[%s436_s4] ss:$0 sm:$0xff] }
  0x1b   :  { %214 = vmatmul.msk.f32.vlgmr.msra.gmra.mxu0 %vm97_vm0, %v88_v7  ;;  %149 = vmatpush.msra.mxu1 %v126_v8  ;;  %v226_v29 = vld [vmem:[%s438_s6] ss:$0 sm:$0xff] }
  0x1c   :  { %184 = vmatpush.msra.mxu2 %v164_v15 }
  0x1d   :  { %150 = vmatpush.msra.mxu1 %v125_v9 }
  0x1e   :  { %185 = vmatpush.msra.mxu2 %v163_v20 }
  0x1f   :  { %151 = vmatpush.msra.mxu1 %v124_v10 }
  0x20   :  { %186 = vmatpush.msra.mxu2 %v162_v21 }
  0x21   :  { %152 = vmatpush.msra.mxu1 %v123_v11 }
  0x22   :  { %187 = vmatpush.msra.mxu2 %v161_v22 }
  0x23   :  { %153 = vmatpush.msra.mxu1 %v122_v12 }
  0x24   :  { %188 = vmatpush.msra.mxu2 %v160_v23 }
  0x26   :  { %189 = vmatpush.msra.mxu2 %v159_v24 }
  0x98   :  { %v118_v17 = vpop.f32.mrf.mxu0 }
  0x99   :  { %v119_v18 = vadd.f32 %v224_v16, %v118_v17 }
  0x9b   :  { %227 = vtanh.f32 %v119_v18 }
  0xa1   :  { %v228_v19 = vpop.eup %227 }
  0xa2   :  { %215 = vmatmul.msk.f32.vlgmr.msra.gmra.mxu1 %vm134_vm1, %v228_v19 }
 0x11f   :  { %v155_v26 = vpop.f32.mrf.mxu1 }
 0x120   :  { %v156_v27 = vadd.f32 %v225_v25, %v155_v26 }
 0x122   :  { %229 = vtanh.f32 %v156_v27 }
 0x128   :  { %v230_v28 = vpop.eup %229 }
 0x129   :  { %216 = vmatmul.msk.f32.vlgmr.msra.gmra.mxu2 %vm134_vm1, %v230_v28 }
 0x1ac   :  { %v191_v30 = vpop.f32.mrf.mxu2 }
 0x1ad   :  { %v192_v31 = vadd.f32 %v226_v29, %v191_v30 }
 0x1af   :  { %194 = vst [vmem:[#allocation10] sm:$0xff] %v192_v31 }
 0x1b0   :  { %205 = dma.vmem_to_hbm [thread:$0]  %s201_s25, 128, %s203_s28, [#allocation4]  }
 0x1b1   :  { %357 = dma.done.wait [#allocation4], 128  }
 0x1b2   :  { %358 = vsyncadd [#allocation4], 4294967168 }
 0x1b3   :  { %210 = vsyncpa [#allocation3], 1 }
 0x1b4   :  { %211 = vsyncpa [#allocation6], 1 }
 0x1b5   :  { %212 = vsyncpa [#allocation9], 1 }
 0x1b6   :  { %213 = vsyncpa [#allocation4], 1 }

</bundles_post_ra>
